<compile_context>
chip_gen: v6e
topology: v6e:2x2x1
jax: 0.10.0
libtpu: 0.0.40
codegen_flags: <defaults>
</compile_context>

<pallas_src>
import functools
import math

import jax
import jax.numpy as jnp
from jax import lax
from jax.experimental import pallas as pl
from jax.experimental.pallas import tpu as pltpu


NUM_LAYERS = 3
_LANE = 128
_MAX_LANES = 512   # prefer widening CW up to this before stacking sublanes


def _kernel_network_kernel(w_ref, x_ref, o_ref, *, H, W, num_layers, compute_dtype):
    """Fused num_layers x (3x3 zero-padded conv) on a packed (Rb*H, P*W) slab.

    w_ref : SMEM ref, shape (num_layers*9,) f32 (flattened 3x3 weights)
    x_ref / o_ref : (RH, CW) tile; RH = Rb*H stacked image rows,
                    CW = P*W side-by-side image columns.
    """
    cdt = compute_dtype
    x = x_ref[...].astype(cdt)
    RH, CW = x.shape

    # Per-image-local boundary masks from SMALL iotas, broadcast once and
    # hoisted out of the layer/tap loops (zero-padding + anti-bleed masks).
    r = lax.broadcasted_iota(jnp.int32, (RH, 1), 0) % H
    c = lax.broadcasted_iota(jnp.int32, (1, CW), 1) % W
    has_up = jnp.broadcast_to(r > 0, (RH, CW))          # row i-1 exists in image
    has_down = jnp.broadcast_to(r < H - 1, (RH, CW))    # row i+1 exists in image
    has_left = jnp.broadcast_to(c > 0, (RH, CW))        # col j-1 exists in image
    has_right = jnp.broadcast_to(c < W - 1, (RH, CW))   # col j+1 exists in image

    for l in range(num_layers):
        # 3x3 weights for this layer: scalar SMEM reads at static offsets.
        w = [[w_ref[9 * l + 3 * di + dj].astype(cdt) for dj in range(3)]
             for di in range(3)]

        # Two sublane (row) rotations shared by all three column taps (XLU).
        x_up = jnp.where(has_up, pltpu.roll(x, 1, 0), 0.0)          # x[i-1, j]
        x_dn = jnp.where(has_down, pltpu.roll(x, RH - 1, 0), 0.0)   # x[i+1, j]

        # Combine row taps per column offset first, then one lane rotation per
        # side column tap (4 rolls/layer total).
        c_left = w[0][0] * x_up + w[1][0] * x + w[2][0] * x_dn      # needs col j-1
        c_mid = w[0][1] * x_up + w[1][1] * x + w[2][1] * x_dn       # col j
        c_right = w[0][2] * x_up + w[1][2] * x + w[2][2] * x_dn     # needs col j+1

        acc = c_mid
        acc = acc + jnp.where(has_left, pltpu.roll(c_left, 1, 1), 0.0)
        acc = acc + jnp.where(has_right, pltpu.roll(c_right, CW - 1, 1), 0.0)
        x = acc

    o_ref[...] = x.astype(o_ref.dtype)


def kernel_network_forward(x_nchw, weights, *, block_bytes=512 * 1024,
                           num_cores=2, compute_dtype=jnp.float32):
    """x_nchw: (N, 1, H, W); weights: (L, 3, 3). Returns (N, 1, H, W)."""
    N, C, H, W = x_nchw.shape
    assert C == 1, "KernelNetwork operates on single-channel inputs"
    num_layers = int(weights.shape[0])
    x = x_nchw.reshape(N, H, W)
    dtype = x.dtype
    itemsize = jnp.dtype(dtype).itemsize

    # --- packing heuristic ---------------------------------------------------
    # Minimal lane packing: smallest P0 with (P0*W) a multiple of 128 lanes.
    P0 = 1 if W % _LANE == 0 else _LANE // math.gcd(W, _LANE)
    img_bytes = H * W * itemsize

    # Images per block: bounded by the VMEM block budget AND by the requirement
    # that the grid has >= num_cores blocks (megacore sharding on v7x) whenever
    # the batch allows.  Always keep at least one lane-packed slab row.
    budget_imgs = max(P0, block_bytes // img_bytes)
    cores_imgs = max(P0, -(-N // max(1, num_cores)))
    imgs_per_block = max(P0, min(budget_imgs, cores_imgs))

    # Lane-first packing: widen CW (images along lanes) up to ~_MAX_LANES before
    # stacking sublane groups.  Keep P a multiple of P0 so CW % 128 == 0.
    if P0 * W <= _MAX_LANES:
        max_lane_imgs = (_MAX_LANES // (P0 * W)) * P0
    else:
        max_lane_imgs = P0          # geometry already >= _MAX_LANES wide
    P = max(P0, (min(imgs_per_block, max_lane_imgs) // P0) * P0)
    Rb = max(1, imgs_per_block // P)
    imgs_per_block = Rb * P

    G = -(-N // imgs_per_block)
    N_pad = G * imgs_per_block
    if N_pad != N:
        x = jnp.concatenate([x, jnp.zeros((N_pad - N, H, W), dtype)], axis=0)

    RH, CW = Rb * H, P * W
    # (N_pad,H,W) -> (G,Rb,P,H,W) -> (G,Rb,H,P,W) -> (G, Rb*H, P*W)
    xp = (x.reshape(G, Rb, P, H, W)
           .transpose(0, 1, 3, 2, 4)
           .reshape(G, RH, CW))

    # Explicit scoped-VMEM budget: ~10 live full-tile temporaries in the compute
    # dtype + double-buffered in/out tiles, with 2x margin.  Clamp to a range
    # that is safe on v5e/v6e (128 MiB phys) and v7x (64 MiB phys).
    cmp_itemsize = jnp.dtype(compute_dtype).itemsize
    vmem_est = 10 * RH * CW * cmp_itemsize + 4 * RH * CW * itemsize
    vmem_limit = int(min(48 * 2**20, max(16 * 2**20, 2 * vmem_est)))

    kernel = functools.partial(_kernel_network_kernel, H=H, W=W,
                               num_layers=num_layers, compute_dtype=compute_dtype)
    out = pl.pallas_call(
        kernel,
        out_shape=jax.ShapeDtypeStruct((G, RH, CW), dtype),
        grid=(G,),
        in_specs=[
            pl.BlockSpec(memory_space=pltpu.SMEM),               # flat weights
            pl.BlockSpec((None, RH, CW), lambda g: (g, 0, 0)),   # one slab/step
        ],
        out_specs=pl.BlockSpec((None, RH, CW), lambda g: (g, 0, 0)),
        compiler_params=pltpu.CompilerParams(
            dimension_semantics=("parallel",),
            vmem_limit_bytes=vmem_limit),
    )(weights.reshape(-1).astype(jnp.float32), xp)

    # Unpack: (G, Rb*H, P*W) -> (N_pad, H, W) -> (N, 1, H, W)
    y = (out.reshape(G, Rb, H, P, W)
            .transpose(0, 1, 3, 2, 4)
            .reshape(N_pad, H, W))
    return y[:N].reshape(N, 1, H, W)


def _reference_forward(x_nchw, weights):
    """Pure-JAX reference using lax.conv_general_dilated (NCHW, OIHW)."""
    x = x_nchw.astype(jnp.float32)
    for l in range(weights.shape[0]):
        w = weights[l].reshape(1, 1, 3, 3).astype(jnp.float32)
        x = lax.conv_general_dilated(
            x, w, window_strides=(1, 1), padding=((1, 1), (1, 1)),
            dimension_numbers=("NCHW", "OIHW", "NCHW"))
    return x


if __name__ == "__main__":
    key = jax.random.PRNGKey(0)
    kx, kw, kx2, kx3 = jax.random.split(key, 4)

    # Deterministic Conv2d-style init: uniform(-1/sqrt(fan_in), 1/sqrt(fan_in)),
    # fan_in = 1 * 3 * 3 = 9  ->  bound = 1/3
    bound = 1.0 / 3.0
    weights = jax.random.uniform(
        kw, (NUM_LAYERS, 3, 3), dtype=jnp.float32, minval=-bound, maxval=bound)

    # 1) Module's natural shapes (N,1,16,16): 8 images per 128-lane slab row.
    N, C, H, W = 2, 1, 16, 16
    x = jax.random.normal(kx, (N, C, H, W), dtype=jnp.float32)
    y = jax.block_until_ready(kernel_network_forward(x, weights))
    y_ref = _reference_forward(x, weights)
    assert y.shape == (N, C, H, W)
    assert jnp.allclose(y, y_ref, atol=1e-4, rtol=1e-4), "mismatch vs reference conv"

    # 2) Different geometry (H=8, W=32 -> P0=4) with batch padding; the cores
    #    cap makes this a multi-block grid (G=3).
    x2 = jax.random.normal(kx2, (9, 1, 8, 32), dtype=jnp.float32)
    y2 = jax.block_until_ready(kernel_network_forward(x2, weights))
    assert jnp.allclose(y2, _reference_forward(x2, weights),
                        atol=1e-4, rtol=1e-4), "mismatch (multi-block grid)"

    # 3) Larger batch: exercises lane-first widening (CW=512), sublane stacking
    #    (Rb=2) and an even two-block grid (G=2) for megacore sharding.
    x3 = jax.random.normal(kx3, (64, 1, 8, 32), dtype=jnp.float32)
    y3 = jax.block_until_ready(kernel_network_forward(x3, weights))
    assert jnp.allclose(y3, _reference_forward(x3, weights),
                        atol=1e-4, rtol=1e-4), "mismatch (wide lanes / Rb>1)"

    # 4) Tiny block budget: forces the budget cap branch and a longer grid.
    y4 = jax.block_until_ready(
        kernel_network_forward(x3, weights, block_bytes=4096))
    assert jnp.allclose(y4, _reference_forward(x3, weights),
                        atol=1e-4, rtol=1e-4), "mismatch (small block budget)"

    # 5) Optional bf16 compute path (v6e/v7x VALU lever); looser tolerance.
    y5 = jax.block_until_ready(
        kernel_network_forward(x, weights, compute_dtype=jnp.bfloat16))
    assert jnp.allclose(y5, y_ref, atol=1e-1, rtol=1e-1), "mismatch (bf16 compute)"

    print("KERNEL_OK")
</pallas_src>

<mosaic_0001>
module attributes {stable_mosaic.version = 11 : i64} {
  func.func @_kernel_network_kernel(%arg0: i32, %arg1: memref<27xf32, #tpu.memory_space<smem>>, %arg2: memref<1x16x128xf32, #tpu.memory_space<vmem>>, %arg3: memref<1x16x128xf32, #tpu.memory_space<vmem>>) attributes {dimension_semantics = [#tpu.dimension_semantics<parallel>], iteration_bounds = array<i64: 1>, scalar_prefetch = 0 : i64, scratch_operands = 0 : i64, tpu.core_type = #tpu.core_type<tc>, window_params = [{transform_indices = @transform_0, window_bounds = array<i64: 27>}, {transform_indices = @transform_1, window_bounds = array<i64: 1, 16, 128>}, {transform_indices = @transform_2, window_bounds = array<i64: 1, 16, 128>}]} {
    %c0 = arith.constant 0 : index
    %c0_0 = arith.constant 0 : index
    %c0_1 = arith.constant 0 : index
    %0 = vector.load %arg2[%c0, %c0_0, %c0_1] : memref<1x16x128xf32, #tpu.memory_space<vmem>>, vector<1x16x128xf32>
    %1 = vector.shape_cast %0 : vector<1x16x128xf32> to vector<16x128xf32>
    %2 = tpu.iota {dimensions = array<i32: 0>} : vector<16x1xi32>
    %c16_i32 = arith.constant 16 : i32
    %c0_i32 = arith.constant 0 : i32
    %3 = arith.cmpi eq, %c16_i32, %c0_i32 : i32
    %c1_i32 = arith.constant 1 : i32
    %4 = arith.select %3, %c1_i32, %c16_i32 : i32
    %5 = vector.broadcast %4 : i32 to vector<16x1xi32>
    %6 = arith.remsi %2, %5 : vector<16x1xi32>
    %c0_i32_2 = arith.constant 0 : i32
    %7 = vector.broadcast %c0_i32_2 : i32 to vector<16x1xi32>
    %8 = arith.cmpi ne, %6, %7 : vector<16x1xi32>
    %c0_i32_3 = arith.constant 0 : i32
    %9 = vector.broadcast %c0_i32_3 : i32 to vector<16x1xi32>
    %10 = arith.cmpi slt, %6, %9 : vector<16x1xi32>
    %c0_i32_4 = arith.constant 0 : i32
    %11 = arith.cmpi slt, %4, %c0_i32_4 : i32
    %12 = vector.broadcast %11 : i1 to vector<16x1xi1>
    %13 = vector.broadcast %12 : vector<16x1xi1> to vector<16x1xi1>
    %14 = arith.xori %10, %13 : vector<16x1xi1>
    %15 = arith.andi %14, %8 : vector<16x1xi1>
    %16 = vector.broadcast %4 : i32 to vector<16x1xi32>
    %17 = arith.addi %6, %16 : vector<16x1xi32>
    %18 = arith.select %15, %17, %6 : vector<16x1xi1>, vector<16x1xi32>
    %19 = tpu.iota {dimensions = array<i32: 1>} : vector<1x128xi32>
    %c16_i32_5 = arith.constant 16 : i32
    %c0_i32_6 = arith.constant 0 : i32
    %20 = arith.cmpi eq, %c16_i32_5, %c0_i32_6 : i32
    %c1_i32_7 = arith.constant 1 : i32
    %21 = arith.select %20, %c1_i32_7, %c16_i32_5 : i32
    %22 = vector.broadcast %21 : i32 to vector<1x128xi32>
    %23 = arith.remsi %19, %22 : vector<1x128xi32>
    %c0_i32_8 = arith.constant 0 : i32
    %24 = vector.broadcast %c0_i32_8 : i32 to vector<1x128xi32>
    %25 = arith.cmpi ne, %23, %24 : vector<1x128xi32>
    %c0_i32_9 = arith.constant 0 : i32
    %26 = vector.broadcast %c0_i32_9 : i32 to vector<1x128xi32>
    %27 = arith.cmpi slt, %23, %26 : vector<1x128xi32>
    %c0_i32_10 = arith.constant 0 : i32
    %28 = arith.cmpi slt, %21, %c0_i32_10 : i32
    %29 = vector.broadcast %28 : i1 to vector<1x128xi1>
    %30 = vector.broadcast %29 : vector<1x128xi1> to vector<1x128xi1>
    %31 = arith.xori %27, %30 : vector<1x128xi1>
    %32 = arith.andi %31, %25 : vector<1x128xi1>
    %33 = vector.broadcast %21 : i32 to vector<1x128xi32>
    %34 = arith.addi %23, %33 : vector<1x128xi32>
    %35 = arith.select %32, %34, %23 : vector<1x128xi1>, vector<1x128xi32>
    %c0_i32_11 = arith.constant 0 : i32
    %36 = vector.broadcast %c0_i32_11 : i32 to vector<16x1xi32>
    %37 = arith.cmpi sgt, %18, %36 : vector<16x1xi32>
    %38 = vector.shape_cast %37 : vector<16x1xi1> to vector<16x1xi1>
    %39 = vector.broadcast %38 : vector<16x1xi1> to vector<16x128xi1>
    %c15_i32 = arith.constant 15 : i32
    %40 = vector.broadcast %c15_i32 : i32 to vector<16x1xi32>
    %41 = arith.cmpi slt, %18, %40 : vector<16x1xi32>
    %42 = vector.shape_cast %41 : vector<16x1xi1> to vector<16x1xi1>
    %43 = vector.broadcast %42 : vector<16x1xi1> to vector<16x128xi1>
    %c0_i32_12 = arith.constant 0 : i32
    %44 = vector.broadcast %c0_i32_12 : i32 to vector<1x128xi32>
    %45 = arith.cmpi sgt, %35, %44 : vector<1x128xi32>
    %46 = vector.shape_cast %45 : vector<1x128xi1> to vector<1x128xi1>
    %47 = vector.broadcast %46 : vector<1x128xi1> to vector<16x128xi1>
    %c15_i32_13 = arith.constant 15 : i32
    %48 = vector.broadcast %c15_i32_13 : i32 to vector<1x128xi32>
    %49 = arith.cmpi slt, %35, %48 : vector<1x128xi32>
    %50 = vector.shape_cast %49 : vector<1x128xi1> to vector<1x128xi1>
    %51 = vector.broadcast %50 : vector<1x128xi1> to vector<16x128xi1>
    %c0_14 = arith.constant 0 : index
    %52 = memref.load %arg1[%c0_14] : memref<27xf32, #tpu.memory_space<smem>>
    %c1 = arith.constant 1 : index
    %53 = memref.load %arg1[%c1] : memref<27xf32, #tpu.memory_space<smem>>
    %c2 = arith.constant 2 : index
    %54 = memref.load %arg1[%c2] : memref<27xf32, #tpu.memory_space<smem>>
    %c3 = arith.constant 3 : index
    %55 = memref.load %arg1[%c3] : memref<27xf32, #tpu.memory_space<smem>>
    %c4 = arith.constant 4 : index
    %56 = memref.load %arg1[%c4] : memref<27xf32, #tpu.memory_space<smem>>
    %c5 = arith.constant 5 : index
    %57 = memref.load %arg1[%c5] : memref<27xf32, #tpu.memory_space<smem>>
    %c6 = arith.constant 6 : index
    %58 = memref.load %arg1[%c6] : memref<27xf32, #tpu.memory_space<smem>>
    %c7 = arith.constant 7 : index
    %59 = memref.load %arg1[%c7] : memref<27xf32, #tpu.memory_space<smem>>
    %c8 = arith.constant 8 : index
    %60 = memref.load %arg1[%c8] : memref<27xf32, #tpu.memory_space<smem>>
    %c1_i32_15 = arith.constant 1 : i32
    %61 = tpu.dynamic_rotate %1 by %c1_i32_15 dim 0 : vector<16x128xf32>, i32 -> vector<16x128xf32>
    %cst = arith.constant 0.000000e+00 : f32
    %62 = vector.broadcast %cst : f32 to vector<16x128xf32>
    %63 = arith.select %39, %61, %62 : vector<16x128xi1>, vector<16x128xf32>
    %c15_i32_16 = arith.constant 15 : i32
    %64 = tpu.dynamic_rotate %1 by %c15_i32_16 dim 0 : vector<16x128xf32>, i32 -> vector<16x128xf32>
    %cst_17 = arith.constant 0.000000e+00 : f32
    %65 = vector.broadcast %cst_17 : f32 to vector<16x128xf32>
    %66 = arith.select %43, %64, %65 : vector<16x128xi1>, vector<16x128xf32>
    %67 = vector.broadcast %52 : f32 to vector<16x128xf32>
    %68 = arith.mulf %67, %63 : vector<16x128xf32>
    %69 = vector.broadcast %55 : f32 to vector<16x128xf32>
    %70 = arith.mulf %69, %1 : vector<16x128xf32>
    %71 = arith.addf %68, %70 : vector<16x128xf32>
    %72 = vector.broadcast %58 : f32 to vector<16x128xf32>
    %73 = arith.mulf %72, %66 : vector<16x128xf32>
    %74 = arith.addf %71, %73 : vector<16x128xf32>
    %75 = vector.broadcast %53 : f32 to vector<16x128xf32>
    %76 = arith.mulf %75, %63 : vector<16x128xf32>
    %77 = vector.broadcast %56 : f32 to vector<16x128xf32>
    %78 = arith.mulf %77, %1 : vector<16x128xf32>
    %79 = arith.addf %76, %78 : vector<16x128xf32>
    %80 = vector.broadcast %59 : f32 to vector<16x128xf32>
    %81 = arith.mulf %80, %66 : vector<16x128xf32>
    %82 = arith.addf %79, %81 : vector<16x128xf32>
    %83 = vector.broadcast %54 : f32 to vector<16x128xf32>
    %84 = arith.mulf %83, %63 : vector<16x128xf32>
    %85 = vector.broadcast %57 : f32 to vector<16x128xf32>
    %86 = arith.mulf %85, %1 : vector<16x128xf32>
    %87 = arith.addf %84, %86 : vector<16x128xf32>
    %88 = vector.broadcast %60 : f32 to vector<16x128xf32>
    %89 = arith.mulf %88, %66 : vector<16x128xf32>
    %90 = arith.addf %87, %89 : vector<16x128xf32>
    %c1_i32_18 = arith.constant 1 : i32
    %91 = tpu.dynamic_rotate %74 by %c1_i32_18 dim 1 : vector<16x128xf32>, i32 -> vector<16x128xf32>
    %cst_19 = arith.constant 0.000000e+00 : f32
    %92 = vector.broadcast %cst_19 : f32 to vector<16x128xf32>
    %93 = arith.select %47, %91, %92 : vector<16x128xi1>, vector<16x128xf32>
    %94 = arith.addf %82, %93 : vector<16x128xf32>
    %c127_i32 = arith.constant 127 : i32
    %95 = tpu.dynamic_rotate %90 by %c127_i32 dim 1 : vector<16x128xf32>, i32 -> vector<16x128xf32>
    %cst_20 = arith.constant 0.000000e+00 : f32
    %96 = vector.broadcast %cst_20 : f32 to vector<16x128xf32>
    %97 = arith.select %51, %95, %96 : vector<16x128xi1>, vector<16x128xf32>
    %98 = arith.addf %94, %97 : vector<16x128xf32>
    %c9 = arith.constant 9 : index
    %99 = memref.load %arg1[%c9] : memref<27xf32, #tpu.memory_space<smem>>
    %c10 = arith.constant 10 : index
    %100 = memref.load %arg1[%c10] : memref<27xf32, #tpu.memory_space<smem>>
    %c11 = arith.constant 11 : index
    %101 = memref.load %arg1[%c11] : memref<27xf32, #tpu.memory_space<smem>>
    %c12 = arith.constant 12 : index
    %102 = memref.load %arg1[%c12] : memref<27xf32, #tpu.memory_space<smem>>
    %c13 = arith.constant 13 : index
    %103 = memref.load %arg1[%c13] : memref<27xf32, #tpu.memory_space<smem>>
    %c14 = arith.constant 14 : index
    %104 = memref.load %arg1[%c14] : memref<27xf32, #tpu.memory_space<smem>>
    %c15 = arith.constant 15 : index
    %105 = memref.load %arg1[%c15] : memref<27xf32, #tpu.memory_space<smem>>
    %c16 = arith.constant 16 : index
    %106 = memref.load %arg1[%c16] : memref<27xf32, #tpu.memory_space<smem>>
    %c17 = arith.constant 17 : index
    %107 = memref.load %arg1[%c17] : memref<27xf32, #tpu.memory_space<smem>>
    %c1_i32_21 = arith.constant 1 : i32
    %108 = tpu.dynamic_rotate %98 by %c1_i32_21 dim 0 : vector<16x128xf32>, i32 -> vector<16x128xf32>
    %cst_22 = arith.constant 0.000000e+00 : f32
    %109 = vector.broadcast %cst_22 : f32 to vector<16x128xf32>
    %110 = arith.select %39, %108, %109 : vector<16x128xi1>, vector<16x128xf32>
    %c15_i32_23 = arith.constant 15 : i32
    %111 = tpu.dynamic_rotate %98 by %c15_i32_23 dim 0 : vector<16x128xf32>, i32 -> vector<16x128xf32>
    %cst_24 = arith.constant 0.000000e+00 : f32
    %112 = vector.broadcast %cst_24 : f32 to vector<16x128xf32>
    %113 = arith.select %43, %111, %112 : vector<16x128xi1>, vector<16x128xf32>
    %114 = vector.broadcast %99 : f32 to vector<16x128xf32>
    %115 = arith.mulf %114, %110 : vector<16x128xf32>
    %116 = vector.broadcast %102 : f32 to vector<16x128xf32>
    %117 = arith.mulf %116, %98 : vector<16x128xf32>
    %118 = arith.addf %115, %117 : vector<16x128xf32>
    %119 = vector.broadcast %105 : f32 to vector<16x128xf32>
    %120 = arith.mulf %119, %113 : vector<16x128xf32>
    %121 = arith.addf %118, %120 : vector<16x128xf32>
    %122 = vector.broadcast %100 : f32 to vector<16x128xf32>
    %123 = arith.mulf %122, %110 : vector<16x128xf32>
    %124 = vector.broadcast %103 : f32 to vector<16x128xf32>
    %125 = arith.mulf %124, %98 : vector<16x128xf32>
    %126 = arith.addf %123, %125 : vector<16x128xf32>
    %127 = vector.broadcast %106 : f32 to vector<16x128xf32>
    %128 = arith.mulf %127, %113 : vector<16x128xf32>
    %129 = arith.addf %126, %128 : vector<16x128xf32>
    %130 = vector.broadcast %101 : f32 to vector<16x128xf32>
    %131 = arith.mulf %130, %110 : vector<16x128xf32>
    %132 = vector.broadcast %104 : f32 to vector<16x128xf32>
    %133 = arith.mulf %132, %98 : vector<16x128xf32>
    %134 = arith.addf %131, %133 : vector<16x128xf32>
    %135 = vector.broadcast %107 : f32 to vector<16x128xf32>
    %136 = arith.mulf %135, %113 : vector<16x128xf32>
    %137 = arith.addf %134, %136 : vector<16x128xf32>
    %c1_i32_25 = arith.constant 1 : i32
    %138 = tpu.dynamic_rotate %121 by %c1_i32_25 dim 1 : vector<16x128xf32>, i32 -> vector<16x128xf32>
    %cst_26 = arith.constant 0.000000e+00 : f32
    %139 = vector.broadcast %cst_26 : f32 to vector<16x128xf32>
    %140 = arith.select %47, %138, %139 : vector<16x128xi1>, vector<16x128xf32>
    %141 = arith.addf %129, %140 : vector<16x128xf32>
    %c127_i32_27 = arith.constant 127 : i32
    %142 = tpu.dynamic_rotate %137 by %c127_i32_27 dim 1 : vector<16x128xf32>, i32 -> vector<16x128xf32>
    %cst_28 = arith.constant 0.000000e+00 : f32
    %143 = vector.broadcast %cst_28 : f32 to vector<16x128xf32>
    %144 = arith.select %51, %142, %143 : vector<16x128xi1>, vector<16x128xf32>
    %145 = arith.addf %141, %144 : vector<16x128xf32>
    %c18 = arith.constant 18 : index
    %146 = memref.load %arg1[%c18] : memref<27xf32, #tpu.memory_space<smem>>
    %c19 = arith.constant 19 : index
    %147 = memref.load %arg1[%c19] : memref<27xf32, #tpu.memory_space<smem>>
    %c20 = arith.constant 20 : index
    %148 = memref.load %arg1[%c20] : memref<27xf32, #tpu.memory_space<smem>>
    %c21 = arith.constant 21 : index
    %149 = memref.load %arg1[%c21] : memref<27xf32, #tpu.memory_space<smem>>
    %c22 = arith.constant 22 : index
    %150 = memref.load %arg1[%c22] : memref<27xf32, #tpu.memory_space<smem>>
    %c23 = arith.constant 23 : index
    %151 = memref.load %arg1[%c23] : memref<27xf32, #tpu.memory_space<smem>>
    %c24 = arith.constant 24 : index
    %152 = memref.load %arg1[%c24] : memref<27xf32, #tpu.memory_space<smem>>
    %c25 = arith.constant 25 : index
    %153 = memref.load %arg1[%c25] : memref<27xf32, #tpu.memory_space<smem>>
    %c26 = arith.constant 26 : index
    %154 = memref.load %arg1[%c26] : memref<27xf32, #tpu.memory_space<smem>>
    %c1_i32_29 = arith.constant 1 : i32
    %155 = tpu.dynamic_rotate %145 by %c1_i32_29 dim 0 : vector<16x128xf32>, i32 -> vector<16x128xf32>
    %cst_30 = arith.constant 0.000000e+00 : f32
    %156 = vector.broadcast %cst_30 : f32 to vector<16x128xf32>
    %157 = arith.select %39, %155, %156 : vector<16x128xi1>, vector<16x128xf32>
    %c15_i32_31 = arith.constant 15 : i32
    %158 = tpu.dynamic_rotate %145 by %c15_i32_31 dim 0 : vector<16x128xf32>, i32 -> vector<16x128xf32>
    %cst_32 = arith.constant 0.000000e+00 : f32
    %159 = vector.broadcast %cst_32 : f32 to vector<16x128xf32>
    %160 = arith.select %43, %158, %159 : vector<16x128xi1>, vector<16x128xf32>
    %161 = vector.broadcast %146 : f32 to vector<16x128xf32>
    %162 = arith.mulf %161, %157 : vector<16x128xf32>
    %163 = vector.broadcast %149 : f32 to vector<16x128xf32>
    %164 = arith.mulf %163, %145 : vector<16x128xf32>
    %165 = arith.addf %162, %164 : vector<16x128xf32>
    %166 = vector.broadcast %152 : f32 to vector<16x128xf32>
    %167 = arith.mulf %166, %160 : vector<16x128xf32>
    %168 = arith.addf %165, %167 : vector<16x128xf32>
    %169 = vector.broadcast %147 : f32 to vector<16x128xf32>
    %170 = arith.mulf %169, %157 : vector<16x128xf32>
    %171 = vector.broadcast %150 : f32 to vector<16x128xf32>
    %172 = arith.mulf %171, %145 : vector<16x128xf32>
    %173 = arith.addf %170, %172 : vector<16x128xf32>
    %174 = vector.broadcast %153 : f32 to vector<16x128xf32>
    %175 = arith.mulf %174, %160 : vector<16x128xf32>
    %176 = arith.addf %173, %175 : vector<16x128xf32>
    %177 = vector.broadcast %148 : f32 to vector<16x128xf32>
    %178 = arith.mulf %177, %157 : vector<16x128xf32>
    %179 = vector.broadcast %151 : f32 to vector<16x128xf32>
    %180 = arith.mulf %179, %145 : vector<16x128xf32>
    %181 = arith.addf %178, %180 : vector<16x128xf32>
    %182 = vector.broadcast %154 : f32 to vector<16x128xf32>
    %183 = arith.mulf %182, %160 : vector<16x128xf32>
    %184 = arith.addf %181, %183 : vector<16x128xf32>
    %c1_i32_33 = arith.constant 1 : i32
    %185 = tpu.dynamic_rotate %168 by %c1_i32_33 dim 1 : vector<16x128xf32>, i32 -> vector<16x128xf32>
    %cst_34 = arith.constant 0.000000e+00 : f32
    %186 = vector.broadcast %cst_34 : f32 to vector<16x128xf32>
    %187 = arith.select %47, %185, %186 : vector<16x128xi1>, vector<16x128xf32>
    %188 = arith.addf %176, %187 : vector<16x128xf32>
    %c127_i32_35 = arith.constant 127 : i32
    %189 = tpu.dynamic_rotate %184 by %c127_i32_35 dim 1 : vector<16x128xf32>, i32 -> vector<16x128xf32>
    %cst_36 = arith.constant 0.000000e+00 : f32
    %190 = vector.broadcast %cst_36 : f32 to vector<16x128xf32>
    %191 = arith.select %51, %189, %190 : vector<16x128xi1>, vector<16x128xf32>
    %192 = arith.addf %188, %191 : vector<16x128xf32>
    %c0_37 = arith.constant 0 : index
    %c0_38 = arith.constant 0 : index
    %c0_39 = arith.constant 0 : index
    %193 = vector.load %arg3[%c0_37, %c0_38, %c0_39] : memref<1x16x128xf32, #tpu.memory_space<vmem>>, vector<1x16x128xf32>
    %194 = vector.shape_cast %193 : vector<1x16x128xf32> to vector<16x128xf32>
    %195 = vector.shape_cast %192 : vector<16x128xf32> to vector<1x16x128xf32>
    tpu.vector_store %arg3[%c0_37, %c0_38, %c0_39], %195 {strides = array<i32>} : memref<1x16x128xf32, #tpu.memory_space<vmem>>, vector<1x16x128xf32>,
    return
  }
  func.func @transform_0(%arg0: i32) -> i32 {
    %c0_i32 = arith.constant 0 : i32
    %c0_i32_0 = arith.constant 0 : i32
    return %c0_i32 : i32
  }
  func.func @transform_1(%arg0: i32) -> (i32, i32, i32) {
    %c0_i32 = arith.constant 0 : i32
    %c0_i32_0 = arith.constant 0 : i32
    %c0_i32_1 = arith.constant 0 : i32
    return %arg0, %c0_i32, %c0_i32_0 : i32, i32, i32
  }
  func.func @transform_2(%arg0: i32) -> (i32, i32, i32) {
    %c0_i32 = arith.constant 0 : i32
    %c0_i32_0 = arith.constant 0 : i32
    %c0_i32_1 = arith.constant 0 : i32
    return %arg0, %c0_i32, %c0_i32_0 : i32, i32, i32
  }
}

</mosaic_0001>

<bundles_post_ra>
// kernel: tpu_custom_call.1
= control target key start
LH: loop header
LB: loop body
LE: loop exit
PB: predicated region body
PF: predicated region fallthrough
CT: control target
= control target key end

     0   :  { %7 = vsyncpa [#allocation5], 0  ;;  %s643_s0 = inlined_call_operand.hbm [shape: f32[27], index: 0, kind: input, shape index: {}]   ;;  %s644_s1 = inlined_call_operand.hbm [shape: f32[1,16,128], index: 1, kind: input, shape index: {}]   ;;  %s645_s2 = inlined_call_operand.hbm [shape: f32[1,16,128], index: 2, kind: output, shape index: {}]  }
   0x1   :  { %8 = vsyncpa [#allocation3], 0 }
   0x2   :  { %9 = vsyncpa [#allocation4], 0  ;;  %s435_s9 = smov [#allocation2]   ;;  %s436_s12 = smov [#allocation6]  }
   0x3   :  { %17 = dma.hbm_to_smem %s643_s0, 16, %s435_s9, [#allocation5]  }
   0x4   :  { %s23_s13 = sshll.u32 %s436_s12, 4  ;;  %s24_s13 = int_to_ptr.vmem [resolvable:$true] %s23_s13 }
   0x5   :  { %s397_s14 = scalar_lea.vmem %s24_s13, 256  ;;  %p402_p1 = scmp.lt.s32.totalorder %s24_s13, %s24_s13 }
   0x6   :  { %p398_p0 = scmp.ne.s32.totalorder %s24_s13, %s397_s14  ;;  %p403_p2 = scmp.lt.s32.totalorder %s397_s14, %s397_s14 }
   0x8   :  { %p404_p3 = por %p403_p2, %p402_p1 }
   0xa   :  { %p405_p4 = pnand %p404_p3, %p398_p0 }
   0xc   :  { %408 = shalt.err (!%p405_p4)
}
   0xd   :  { %s437_s15 = smov 128   ;;  %s438_s16 = smov 8  }
   0xe   :  { %29 = dma.hbm_to_vmem [thread:$0]  %s644_s1, 256, %s24_s13, [#allocation3], %s437_s15, %s437_s15, %s438_s16  }
   0xf   :  { %429 = dma.done.wait [#allocation5], 16  }
  0x10   :  { %430 = vsyncadd [#allocation5], 4294967280 }
  0x11   :  { %431 = dma.done.wait [#allocation3], 256  }
  0x12   :  { %432 = vsyncadd [#allocation3], 4294967040 }
  0x13   :  { %36 = sfence }
  0x14   :  { %v37_v0 = vld [vmem:[#allocation6] sm:$0xff]  ;;  %v38_v1 = vld [vmem:[#allocation6 + $0x8] sm:$0xff]  ;;  %v39_v2 = vlaneseq  ;;  %s98_s0 = sld [smem:[#allocation2]]  ;;  %s439_s26 = smov 1  }
  0x15   :  { %s350_s19 = sld [smem:[#allocation2 + $0x3]]  ;;  %v107_v3 = vrot.slane %v37_v0, 7  ;;  %v108_v4 = vrot.slane %v38_v1, 7  ;;  %v114_v6 = vrot.slane %v37_v0, 1  ;;  %v115_v7 = vrot.slane %v38_v1, 1  ;;  %s440_s27 = smov 127  }
  0x16   :  { %v467_v5 = vshrl.u32 %v39_v2, 7  ;;  %s469_s20 = sld [smem:[#allocation2 + $0x6]]  ;;  %v67_v58 = vand.u32 127, %v39_v2 }
  0x17   :  { %s471_s1 = sld [smem:[#allocation2 + $0x2]] }
  0x18   :  { %v41_v8 = vadd.s32 8, %v467_v5  ;;  %v46_v9 = vand.u32 15, %v467_v5  ;;  %vm109_vm0 = vcmp.lt.s32.totalorder %v467_v5, 1  ;;  %vm116_vm1 = vcmp.lt.s32.totalorder %v467_v5, 7  ;;  %s477_s21 = sld [smem:[#allocation2 + $0x5]] }
  0x19   :  { %v111_v10 = vsel %vm109_vm0, %v108_v4, %v107_v3  ;;  %v110_v11 = vsel %vm109_vm0, %v107_v3, %v108_v4  ;;  %s483_s22 = sld [smem:[#allocation2 + $0x8]]  ;;  %v118_v14 = vsel %vm116_vm1, %v115_v7, %v114_v6  ;;  %v117_v17 = vsel %vm116_vm1, %v114_v6, %v115_v7 }
  0x1a   :  { %v53_v12 = vand.u32 15, %v41_v8  ;;  %vm485_vm2 = vcmp.gt.s32.totalorder %v46_v9, 0  ;;  %v121_v15 = vstv %s98_s0  ;;  %s491_s23 = sld [smem:[#allocation2 + $0x1]]  ;;  %v72_v59 = vand.u32 15, %v67_v58 }
  0x1b   :  { %v112_v16 = vsel %vm485_vm2, %v111_v10, 0.0  ;;  %v124_v18 = vstv %s350_s19  ;;  %v123_v19 = vmul.f32 %v121_v15, %v110_v11  ;;  %s497_s24 = sld [smem:[#allocation2 + $0x4]]  ;;  %s441_s19 = smov [#allocation7]  }
  0x1c   :  { %vm499_vm3 = vcmp.lt.s32.totalorder %v53_v12, 15  ;;  %v122_v21 = vmul.f32 %v121_v15, %v112_v16  ;;  %v125_v22 = vmul.f32 %v124_v18, %v37_v0  ;;  %v126_v23 = vmul.f32 %v124_v18, %v38_v1  ;;  %s503_s25 = sld [smem:[#allocation2 + $0x7]] }
  0x1d   :  { %v120_v24 = vsel %vm499_vm3, %v118_v14, 0.0  ;;  %v129_v25 = vstv %s469_s20  ;;  %v147_v26 = vstv %s471_s1  ;;  %s519_s28 = sld [smem:[#allocation2 + $0x9]]  ;;  %vm525_vm4 = vcmp.gt.s32.totalorder %v72_v59, 0  ;;  %s335_s20 = sshll.u32 %s441_s19, 4  ;;  %s336_s20 = int_to_ptr.vmem [resolvable:$true] %s335_s20 }
  0x1e   :  { %v127_v27 = vadd.f32 %v125_v22, %v122_v21  ;;  %v130_v28 = vmul.f32 %v129_v25, %v117_v17  ;;  %v131_v29 = vmul.f32 %v129_v25, %v120_v24  ;;  %v148_v30 = vmul.f32 %v147_v26, %v112_v16  ;;  %s521_s29 = sld [smem:[#allocation2 + $0xc]]  ;;  %s409_s1 = scalar_lea.vmem %s336_s20, 256 }
  0x1f   :  { %v150_v31 = vstv %s477_s21  ;;  %v155_v32 = vstv %s483_s22  ;;  %v149_v33 = vmul.f32 %v147_v26, %v110_v11  ;;  %v128_v34 = vadd.f32 %v126_v23, %v123_v19  ;;  %s523_s30 = sld [smem:[#allocation2 + $0xf]]  ;;  %p410_p5 = scmp.ne.s32.totalorder %s336_s20, %s409_s1 }
  0x20   :  { %v132_v35 = vadd.f32 %v130_v28, %v127_v27  ;;  %v151_v36 = vmul.f32 %v150_v31, %v37_v0  ;;  %v152_v37 = vmul.f32 %v150_v31, %v38_v1  ;;  %v156_v38 = vmul.f32 %v155_v32, %v117_v17  ;;  %s529_s3 = sld [smem:[#allocation2 + $0xb]]  ;;  %p414_p6 = scmp.lt.s32.totalorder %s336_s20, %s336_s20 }
  0x21   :  { %v157_v39 = vmul.f32 %v155_v32, %v120_v24  ;;  %v133_v40 = vadd.f32 %v131_v29, %v128_v34  ;;  %v134_v41 = vstv %s491_s23  ;;  %v137_v42 = vstv %s497_s24  ;;  %s531_s4 = sld [smem:[#allocation2 + $0xe]]  ;;  %p415_p7 = scmp.lt.s32.totalorder %s409_s1, %s409_s1 }
  0x22   :  { %160 = vrot.lane.b32.xlu0 %v132_v35, %s439_s26  ;;  %v153_v43 = vadd.f32 %v151_v36, %v148_v30  ;;  %v154_v44 = vadd.f32 %v152_v37, %v149_v33  ;;  %v135_v45 = vmul.f32 %v134_v41, %v112_v16  ;;  %v138_v46 = vmul.f32 %v137_v42, %v37_v0  ;;  %s533_s5 = sld [smem:[#allocation2 + $0x11]] }
  0x23   :  { %v142_v47 = vstv %s503_s25  ;;  %v136_v48 = vmul.f32 %v134_v41, %v110_v11  ;;  %v139_v49 = vmul.f32 %v137_v42, %v38_v1  ;;  %s537_s6 = sld [smem:[#allocation2 + $0xa]]  ;;  %vm539_vm5 = vcmp.lt.s32.totalorder %v72_v59, 15  ;;  %p416_p8 = por %p415_p7, %p414_p6 }
  0x24   :  { %v158_v50 = vadd.f32 %v156_v38, %v153_v43  ;;  %v140_v51 = vadd.f32 %v138_v46, %v135_v45  ;;  %v143_v52 = vmul.f32 %v142_v47, %v117_v17  ;;  %v144_v54 = vmul.f32 %v142_v47, %v120_v24  ;;  %s543_s7 = sld [smem:[#allocation2 + $0xd]] }
  0x25   :  { %v141_v53 = vadd.f32 %v139_v49, %v136_v48  ;;  %v159_v55 = vadd.f32 %v157_v39, %v154_v44  ;;  %s545_s8 = sld [smem:[#allocation2 + $0x10]]  ;;  %v197_v10 = vstv %s519_s28  ;;  %v200_v11 = vstv %s521_s29  ;;  %p417_p9 = pnand %p416_p8, %p410_p5 }
  0x26   :  { %168 = vrot.lane.b32.xlu1 %v158_v50, %s440_s27  ;;  %162 = vrot.lane.b32.xlu0 %v133_v40, %s439_s26  ;;  %v145_v56 = vadd.f32 %v143_v52, %v140_v51  ;;  %v205_v12 = vstv %s523_s30  ;;  %v223_v15 = vstv %s529_s3  ;;  %s578_s9 = sld [smem:[#allocation2 + $0x15]] }
  0x27   :  { %v146_v57 = vadd.f32 %v144_v54, %v141_v53  ;;  %v226_v16 = vstv %s531_s4  ;;  %s580_s10 = sld [smem:[#allocation2 + $0x17]] }
  0x28   :  { %v231_v19 = vstv %s533_s5  ;;  %s582_s11 = sld [smem:[#allocation2 + $0x16]] }
  0x29   :  { %v210_v21 = vstv %s537_s6  ;;  %s584_s12 = sld [smem:[#allocation2 + $0x12]] }
  0x2a   :  { %170 = vrot.lane.b32.xlu1 %v159_v55, %s440_s27  ;;  %v213_v17 = vstv %s543_s7  ;;  %s586_s13 = sld [smem:[#allocation2 + $0x18]] }
  0x2b   :  { %v218_v22 = vstv %s545_s8  ;;  %s588_s14 = sld [smem:[#allocation2 + $0x14]] }
  0x2c   :  { %s590_s17 = sld [smem:[#allocation2 + $0x1a]] }
  0x2d   :  { %s592_s18 = sld [smem:[#allocation2 + $0x13]] }
  0x2e   :  { %s596_s0 = sld [smem:[#allocation2 + $0x19]] }
  0x94   :  { %v161_v61 = vpop.permute.xlu0 %160 }
  0x95   :  { %v164_v62 = vsel %vm525_vm4, %v161_v61, 0.0 }
  0x96   :  { %v166_v0 = vadd.f32 %v164_v62, %v145_v56 }
  0x98   :  { %v169_v1 = vpop.permute.xlu1 %168  ;;  %v163_v2 = vpop.permute.xlu0 %162 }
  0x99   :  { %v172_v3 = vsel %vm539_vm5, %v169_v1, 0.0  ;;  %v165_v4 = vsel %vm525_vm4, %v163_v2, 0.0 }
  0x9a   :  { %v167_v6 = vadd.f32 %v165_v4, %v146_v57  ;;  %v174_v7 = vadd.f32 %v172_v3, %v166_v0 }
  0x9c   :  { %v171_v8 = vpop.permute.xlu1 %170  ;;  %v185_v18 = vrot.slane %v174_v7, 7  ;;  %v191_v24 = vrot.slane %v174_v7, 1  ;;  %v201_v26 = vmul.f32 %v200_v11, %v174_v7  ;;  %v227_v29 = vmul.f32 %v226_v16, %v174_v7 }
  0x9d   :  { %v173_v9 = vsel %vm539_vm5, %v171_v8, 0.0  ;;  %v214_v30 = vmul.f32 %v213_v17, %v174_v7 }
  0x9e   :  { %v175_v14 = vadd.f32 %v173_v9, %v167_v6 }
  0xa0   :  { %v186_v23 = vrot.slane %v175_v14, 7  ;;  %v192_v25 = vrot.slane %v175_v14, 1  ;;  %v202_v27 = vmul.f32 %v200_v11, %v175_v14  ;;  %v228_v28 = vmul.f32 %v226_v16, %v175_v14 }
  0xa1   :  { %v215_v38 = vmul.f32 %v213_v17, %v175_v14  ;;  %v302_v14 = vstv %s580_s10  ;;  %v273_v17 = vstv %s584_s12 }
  0xa2   :  { %v187_v31 = vsel %vm109_vm0, %v185_v18, %v186_v23  ;;  %v194_v32 = vsel %vm116_vm1, %v192_v25, %v191_v24  ;;  %v188_v33 = vsel %vm109_vm0, %v186_v23, %v185_v18  ;;  %v193_v34 = vsel %vm116_vm1, %v191_v24, %v192_v25 }
  0xa3   :  { %v196_v35 = vsel %vm499_vm3, %v194_v32, 0.0  ;;  %v199_v36 = vmul.f32 %v197_v10, %v187_v31  ;;  %v189_v37 = vsel %vm485_vm2, %v188_v33, 0.0  ;;  %v225_v41 = vmul.f32 %v223_v15, %v187_v31 }
  0xa4   :  { %v207_v39 = vmul.f32 %v205_v12, %v196_v35  ;;  %v198_v40 = vmul.f32 %v197_v10, %v189_v37  ;;  %v233_v42 = vmul.f32 %v231_v19, %v196_v35  ;;  %v206_v44 = vmul.f32 %v205_v12, %v193_v34 }
  0xa5   :  { %v204_v43 = vadd.f32 %v202_v27, %v199_v36  ;;  %v224_v45 = vmul.f32 %v223_v15, %v189_v37  ;;  %v212_v46 = vmul.f32 %v210_v21, %v187_v31  ;;  %v230_v48 = vadd.f32 %v228_v28, %v225_v41 }
  0xa6   :  { %v203_v47 = vadd.f32 %v201_v26, %v198_v40  ;;  %v220_v49 = vmul.f32 %v218_v22, %v196_v35  ;;  %v211_v50 = vmul.f32 %v210_v21, %v189_v37  ;;  %v232_v53 = vmul.f32 %v231_v19, %v193_v34 }
  0xa7   :  { %v209_v51 = vadd.f32 %v207_v39, %v204_v43  ;;  %v229_v52 = vadd.f32 %v227_v29, %v224_v45  ;;  %v217_v54 = vadd.f32 %v215_v38, %v212_v46  ;;  %v235_v56 = vadd.f32 %v233_v42, %v230_v48 }
  0xa8   :  { %v208_v55 = vadd.f32 %v206_v44, %v203_v47  ;;  %v216_v57 = vadd.f32 %v214_v30, %v211_v50  ;;  %v219_v58 = vmul.f32 %v218_v22, %v193_v34  ;;  %v276_v10 = vstv %s578_s9 }
  0xa9   :  { %238 = vrot.lane.b32.xlu1 %v209_v51, %s439_s26  ;;  %v234_v59 = vadd.f32 %v232_v53, %v229_v52  ;;  %v222_v61 = vadd.f32 %v220_v49, %v217_v54  ;;  %v289_v15 = vstv %s582_s11  ;;  %v281_v18 = vstv %s586_s13 }
  0xaa   :  { %236 = vrot.lane.b32.xlu0 %v208_v55, %s439_s26  ;;  %v221_v62 = vadd.f32 %v219_v58, %v216_v57  ;;  %v299_v19 = vstv %s588_s14  ;;  %v307_v23 = vstv %s590_s17  ;;  %v286_v24 = vstv %s592_s18 }
  0xab   :  { %v294_v28 = vstv %s596_s0 }
  0xad   :  { %246 = vrot.lane.b32.xlu1 %v235_v56, %s440_s27 }
  0xae   :  { %244 = vrot.lane.b32.xlu0 %v234_v59, %s440_s27 }
 0x11b   :  { %v239_v0 = vpop.permute.xlu1 %238 }
 0x11c   :  { %v241_v1 = vsel %vm525_vm4, %v239_v0, 0.0  ;;  %v237_v2 = vpop.permute.xlu0 %236 }
 0x11d   :  { %v240_v3 = vsel %vm525_vm4, %v237_v2, 0.0  ;;  %v243_v4 = vadd.f32 %v241_v1, %v222_v61 }
 0x11e   :  { %v242_v7 = vadd.f32 %v240_v3, %v221_v62 }
 0x11f   :  { %v247_v6 = vpop.permute.xlu1 %246 }
 0x120   :  { %v249_v8 = vsel %vm539_vm5, %v247_v6, 0.0  ;;  %v245_v9 = vpop.permute.xlu0 %244 }
 0x121   :  { %v251_v11 = vadd.f32 %v249_v8, %v243_v4  ;;  %v248_v12 = vsel %vm539_vm5, %v245_v9, 0.0 }
 0x122   :  { %v250_v16 = vadd.f32 %v248_v12, %v242_v7 }
 0x123   :  { %v262_v21 = vrot.slane %v251_v11, 7  ;;  %v268_v22 = vrot.slane %v251_v11, 1  ;;  %v278_v27 = vmul.f32 %v276_v10, %v251_v11  ;;  %v304_v30 = vmul.f32 %v302_v14, %v251_v11 }
 0x124   :  { %v261_v25 = vrot.slane %v250_v16, 7  ;;  %v267_v26 = vrot.slane %v250_v16, 1  ;;  %v277_v29 = vmul.f32 %v276_v10, %v250_v16  ;;  %v303_v31 = vmul.f32 %v302_v14, %v250_v16 }
 0x125   :  { %v291_v32 = vmul.f32 %v289_v15, %v251_v11  ;;  %v290_v40 = vmul.f32 %v289_v15, %v250_v16 }
 0x126   :  { %v263_v33 = vsel %vm109_vm0, %v261_v25, %v262_v21  ;;  %v270_v34 = vsel %vm116_vm1, %v268_v22, %v267_v26  ;;  %v264_v35 = vsel %vm109_vm0, %v262_v21, %v261_v25  ;;  %v269_v36 = vsel %vm116_vm1, %v267_v26, %v268_v22 }
 0x127   :  { %v272_v37 = vsel %vm499_vm3, %v270_v34, 0.0  ;;  %v275_v38 = vmul.f32 %v273_v17, %v263_v33  ;;  %v265_v39 = vsel %vm485_vm2, %v264_v35, 0.0  ;;  %v301_v43 = vmul.f32 %v299_v19, %v263_v33 }
 0x128   :  { %v283_v41 = vmul.f32 %v281_v18, %v272_v37  ;;  %v274_v42 = vmul.f32 %v273_v17, %v265_v39  ;;  %v309_v44 = vmul.f32 %v307_v23, %v272_v37  ;;  %v282_v46 = vmul.f32 %v281_v18, %v269_v36 }
 0x129   :  { %v280_v45 = vadd.f32 %v278_v27, %v275_v38  ;;  %v300_v47 = vmul.f32 %v299_v19, %v265_v39  ;;  %v288_v48 = vmul.f32 %v286_v24, %v263_v33  ;;  %v306_v50 = vadd.f32 %v304_v30, %v301_v43 }
 0x12a   :  { %v279_v49 = vadd.f32 %v277_v29, %v274_v42  ;;  %v296_v5 = vmul.f32 %v294_v28, %v272_v37  ;;  %v287_v51 = vmul.f32 %v286_v24, %v265_v39  ;;  %v308_v53 = vmul.f32 %v307_v23, %v269_v36 }
 0x12b   :  { %v285_v52 = vadd.f32 %v283_v41, %v280_v45  ;;  %v305_v20 = vadd.f32 %v303_v31, %v300_v47  ;;  %v293_v54 = vadd.f32 %v291_v32, %v288_v48  ;;  %v311_v13 = vadd.f32 %v309_v44, %v306_v50 }
 0x12c   :  { %v284_v55 = vadd.f32 %v282_v46, %v279_v49  ;;  %v292_v56 = vadd.f32 %v290_v40, %v287_v51  ;;  %v295_v57 = vmul.f32 %v294_v28, %v269_v36 }
 0x12d   :  { %314 = vrot.lane.b32.xlu1 %v285_v52, %s439_s26  ;;  %v310_v58 = vadd.f32 %v308_v53, %v305_v20  ;;  %v298_v59 = vadd.f32 %v296_v5, %v293_v54 }
 0x12e   :  { %312 = vrot.lane.b32.xlu0 %v284_v55, %s439_s26  ;;  %v297_v61 = vadd.f32 %v295_v57, %v292_v56 }
 0x131   :  { %322 = vrot.lane.b32.xlu1 %v311_v13, %s440_s27 }
 0x132   :  { %320 = vrot.lane.b32.xlu0 %v310_v58, %s440_s27 }
 0x19f   :  { %v315_v62 = vpop.permute.xlu1 %314 }
 0x1a0   :  { %v317_v0 = vsel %vm525_vm4, %v315_v62, 0.0  ;;  %v313_v1 = vpop.permute.xlu0 %312 }
 0x1a1   :  { %v316_v2 = vsel %vm525_vm4, %v313_v1, 0.0  ;;  %v319_v3 = vadd.f32 %v317_v0, %v298_v59 }
 0x1a2   :  { %v318_v6 = vadd.f32 %v316_v2, %v297_v61 }
 0x1a3   :  { %v323_v4 = vpop.permute.xlu1 %322 }
 0x1a4   :  { %v325_v7 = vsel %vm539_vm5, %v323_v4, 0.0  ;;  %v321_v8 = vpop.permute.xlu0 %320 }
 0x1a5   :  { %v327_v9 = vadd.f32 %v325_v7, %v319_v3  ;;  %v324_v10 = vsel %vm539_vm5, %v321_v8, 0.0 }
 0x1a6   :  { %v326_v11 = vadd.f32 %v324_v10, %v318_v6 }
 0x1a7   :  { %329 = vst [vmem:[#allocation7 + $0x8] sm:$0xff] %v327_v9 }
 0x1a8   :  { %328 = vst [vmem:[#allocation7] sm:$0xff] %v326_v11 }
 0x1a9   :  { %420 = shalt.err (!%p417_p9)
}
 0x1aa   :  { %341 = dma.vmem_to_hbm [thread:$0]  %s336_s20, 256, %s645_s2, [#allocation4], %s437_s15, %s437_s15, %s438_s16  }
 0x1ab   :  { %433 = dma.done.wait [#allocation4], 256  }
 0x1ac   :  { %434 = vsyncadd [#allocation4], 4294967040 }
 0x1ad   :  { %345 = vsyncpa [#allocation3], 1 }
 0x1ae   :  { %346 = vsyncpa [#allocation4], 1 }
 0x1af   :  { %347 = vsyncpa [#allocation5], 1 }

</bundles_post_ra>
